<compile_context>
chip_gen: v7x
topology: tpu7x:2x2x1
jax: 0.10.0
libtpu: 0.0.40
codegen_flags: <defaults>
</compile_context>

<pallas_src>
import functools
import math

import jax
import jax.numpy as jnp
from jax.experimental import pallas as pl
from jax.experimental.pallas import tpu as pltpu


# ----------------------------------------------------------------------------
# helpers
# ----------------------------------------------------------------------------
def _round_up(n, m):
    return ((n + m - 1) // m) * m


# ----------------------------------------------------------------------------
# Fused kernel: the full MLP on one (TILE_M, K0_pad) activation tile.
#   refs = (x_ref, w0, b0, w1, b1, ..., o_ref, act_a, act_b)
#     x_ref      : (TILE_M, K0_pad) f32
#     w_i        : (K_i_pad, N_i_pad) bf16   (VMEM resident across the grid)
#     b_i        : (1, N_i_pad) f32
#     o_ref      : (TILE_M, N_last_pad) f32
#     act_a/act_b: (TILE_M, max_N_pad) f32 ping-pong activation scratch
# All padded lanes are exactly zero through the affine + LeakyReLU chain
# (weight pad rows/cols and bias pad entries are zero).
# ----------------------------------------------------------------------------
def _fnn_fused_kernel(*refs, num_layers, slope, k_pads, n_pads):
    x_ref = refs[0]
    wb_refs = refs[1:1 + 2 * num_layers]
    o_ref = refs[1 + 2 * num_layers]
    scratch = (refs[2 + 2 * num_layers], refs[3 + 2 * num_layers])

    for i in range(num_layers):                       # static depth -> unrolled
        k_pad, n_pad = k_pads[i], n_pads[i]
        if i == 0:
            h = x_ref[...]                            # (TILE_M, K0_pad) f32
        else:
            h = scratch[(i - 1) % 2][:, :k_pad]       # previous layer's output
        w = wb_refs[2 * i][...]                       # (K_pad, N_pad) bf16
        b = wb_refs[2 * i + 1][...]                   # (1, N_pad) f32
        # bf16 MXU feed, f32 accumulation; bias add + activation in f32.
        y = jnp.dot(h.astype(jnp.bfloat16), w,
                    preferred_element_type=jnp.float32) + b
        if i < num_layers - 1:                        # LeakyReLU on hidden only
            y = jnp.where(y > 0, y, slope * y)
            scratch[i % 2][:, :n_pad] = y             # bound live range in VMEM
        else:
            o_ref[...] = y.astype(o_ref.dtype)


def fnn_forward(prepared_params, x, *, out_size, leaky_relu_slope=0.1,
                tile_m_max=256):
    """Fused forward: leaky_relu(x @ W1 + b1) ... @ Wn + bn.

    prepared_params: list of (w_t_pad (K_pad, N_pad) bf16, b_pad (1, N_pad) f32).
    x: (batch, input_size) f32.  Returns (batch, out_size) f32 logits.
    """
    m, k = x.shape
    num_layers = len(prepared_params)
    k_pads = [w.shape[0] for w, _ in prepared_params]
    n_pads = [w.shape[1] for w, _ in prepared_params]
    k0_pad = k_pads[0]
    n_out_pad = n_pads[-1]
    max_n_pad = max(n_pads)

    # M tile: >= 16 rows (bf16 sublane packing), capped for large batch.
    tile_m = tile_m_max if m >= tile_m_max else _round_up(m, 16)
    m_pad = _round_up(m, tile_m)
    num_tiles = m_pad // tile_m

    # TODO(synk): for very large batch, replace this pad + trailing slice with
    # a masked ragged-last-tile store to avoid the extra HBM round trip.
    x_pad = jnp.pad(x, ((0, m_pad - m), (0, k0_pad - k)))

    flat_inputs = [x_pad]
    in_specs = [pl.BlockSpec((tile_m, k0_pad), lambda i: (i, 0))]
    for w_t, b in prepared_params:
        flat_inputs += [w_t, b]
        # Block index (0, 0) on every grid step -> fetched once, VMEM resident.
        in_specs += [
            pl.BlockSpec(w_t.shape, lambda i: (0, 0)),
            pl.BlockSpec(b.shape, lambda i: (0, 0)),
        ]

    kernel = functools.partial(
        _fnn_fused_kernel,
        num_layers=num_layers,
        slope=leaky_relu_slope,
        k_pads=tuple(k_pads),
        n_pads=tuple(n_pads),
    )

    # VMEM budget: resident weights/biases + double-buffered x/out tiles +
    # ping-pong activation scratch (all static Python ints).
    weight_bytes = sum(int(w.size) * w.dtype.itemsize +
                       int(b.size) * b.dtype.itemsize
                       for w, b in prepared_params)
    tile_bytes = 2 * (tile_m * k0_pad * 4 + tile_m * n_out_pad * 4)
    scratch_bytes = 2 * tile_m * max_n_pad * 4
    footprint = weight_bytes + tile_bytes + scratch_bytes
    # Clamp below v7x's 64 MiB physical VMEM.
    vmem_limit = int(min(64 * 1024 * 1024, 2 * footprint + 8 * 1024 * 1024))
    # TODO(synk): if the resident weight set alone approaches ~48 MiB (v7x),
    # add an N grid axis with the accumulator pattern instead of full residency.

    flops = 2 * m_pad * sum(kp * np_ for kp, np_ in zip(k_pads, n_pads))
    bytes_accessed = m_pad * k0_pad * 4 + weight_bytes + m_pad * n_out_pad * 4

    out_pad = pl.pallas_call(
        kernel,
        out_shape=jax.ShapeDtypeStruct((m_pad, n_out_pad), jnp.float32),
        grid=(num_tiles,),
        in_specs=in_specs,
        out_specs=pl.BlockSpec((tile_m, n_out_pad), lambda i: (i, 0)),
        scratch_shapes=[
            pltpu.VMEM((tile_m, max_n_pad), jnp.float32),
            pltpu.VMEM((tile_m, max_n_pad), jnp.float32),
        ],
        compiler_params=pltpu.CompilerParams(
            dimension_semantics=("parallel",),   # v7x: batch tiles over 2 TCs
            vmem_limit_bytes=vmem_limit,
        ),
        cost_estimate=pl.CostEstimate(
            flops=flops, transcendentals=0, bytes_accessed=bytes_accessed),
    )(*flat_inputs)

    return out_pad[:m, :out_size]


# ----------------------------------------------------------------------------
# Parameter init replicating the PyTorch module's __init__:
#   weight: xavier_uniform_ (stored in PyTorch (out, in) layout)
#   bias:   default nn.Linear init U(-1/sqrt(fan_in), +1/sqrt(fan_in))
# ----------------------------------------------------------------------------
def init_fnn_params(key, input_size, output_size, hidden_dims):
    layer_dims = [input_size] + list(hidden_dims) + [output_size]
    params = []
    for i in range(len(layer_dims) - 1):
        fan_in, fan_out = layer_dims[i], layer_dims[i + 1]
        key, kw, kb = jax.random.split(key, 3)
        limit = math.sqrt(6.0 / (fan_in + fan_out))        # xavier_uniform_
        w = jax.random.uniform(kw, (fan_out, fan_in), jnp.float32,
                               minval=-limit, maxval=limit)
        b_bound = 1.0 / math.sqrt(fan_in)                  # nn.Linear bias init
        b = jax.random.uniform(kb, (fan_out,), jnp.float32,
                               minval=-b_bound, maxval=b_bound)
        params.append((w, b))
    return params


def prepare_params(params):
    """One-time prep: transpose weights to (K, N), zero-pad feature dims to
    multiples of 128, and narrow the weights to bf16 (biases stay f32).

    Zero padding is exact: padded input lanes are 0 and padded weight rows/cols
    and bias entries are 0, so padded output lanes stay exactly 0 through
    LeakyReLU.  bf16(0) == 0, so narrowing preserves this.
    """
    prepared = []
    for w, b in params:
        n, k = w.shape                              # PyTorch (out, in)
        k_pad = _round_up(k, 128)
        n_pad = _round_up(n, 128)
        w_t = jnp.pad(w.T, ((0, k_pad - k), (0, n_pad - n))).astype(jnp.bfloat16)
        b_p = jnp.pad(b.reshape(1, n), ((0, 0), (0, n_pad - n))).astype(jnp.float32)
        prepared.append((w_t, b_p))
    return prepared


# Pure-JAX f32 reference (original un-padded PyTorch-layout params).
def _fnn_ref(params, x, slope=0.1):
    for w, b in params[:-1]:
        y = x @ w.T + b
        x = jnp.where(y > 0, y, slope * y)
    w, b = params[-1]
    return x @ w.T + b


if __name__ == "__main__":
    # Small shapes consistent with the module: batch=8, input=32,
    # hidden_dims=[64, 64], output=16.
    batch, input_size, output_size = 8, 32, 16
    hidden_dims = [64, 64]

    key = jax.random.PRNGKey(0)
    key, kx = jax.random.split(key)
    x = jax.random.normal(kx, (batch, input_size), jnp.float32)

    params = init_fnn_params(key, input_size, output_size, hidden_dims)
    prepared = prepare_params(params)

    forward = jax.jit(
        lambda p, xx: fnn_forward(p, xx, out_size=output_size,
                                  leaky_relu_slope=0.1)
    )

    out = jax.block_until_ready(forward(prepared, x))

    ref = _fnn_ref(params, x)
    assert out.shape == (batch, output_size)
    # bf16 weight / activation feed -> tolerance-gated vs the f32 reference.
    assert jnp.allclose(out, ref, atol=5e-2, rtol=5e-2)

    print("KERNEL_OK")
</pallas_src>

<mosaic_0001>
module attributes {stable_mosaic.version = 11 : i64} {
  func.func @_fnn_fused_kernel(%arg0: i32, %arg1: memref<16x128xf32, #tpu.memory_space<vmem>>, %arg2: memref<128x128xbf16, #tpu.memory_space<vmem>>, %arg3: memref<1x128xf32, #tpu.memory_space<vmem>>, %arg4: memref<128x128xbf16, #tpu.memory_space<vmem>>, %arg5: memref<1x128xf32, #tpu.memory_space<vmem>>, %arg6: memref<128x128xbf16, #tpu.memory_space<vmem>>, %arg7: memref<1x128xf32, #tpu.memory_space<vmem>>, %arg8: memref<16x128xf32, #tpu.memory_space<vmem>>, %arg9: memref<16x128xf32, #tpu.memory_space<vmem>>, %arg10: memref<16x128xf32, #tpu.memory_space<vmem>>) attributes {dimension_semantics = [#tpu.dimension_semantics<parallel>], iteration_bounds = array<i64: 1>, scalar_prefetch = 0 : i64, scratch_operands = 2 : i64, tpu.core_type = #tpu.core_type<tc>, window_params = [{transform_indices = @transform_0, window_bounds = array<i64: 16, 128>}, {pipeline_mode = #tpu.pipeline_mode<synchronous>, transform_indices = @transform_1, window_bounds = array<i64: 128, 128>}, {pipeline_mode = #tpu.pipeline_mode<synchronous>, transform_indices = @transform_2, window_bounds = array<i64: 1, 128>}, {pipeline_mode = #tpu.pipeline_mode<synchronous>, transform_indices = @transform_3, window_bounds = array<i64: 128, 128>}, {pipeline_mode = #tpu.pipeline_mode<synchronous>, transform_indices = @transform_4, window_bounds = array<i64: 1, 128>}, {pipeline_mode = #tpu.pipeline_mode<synchronous>, transform_indices = @transform_5, window_bounds = array<i64: 128, 128>}, {pipeline_mode = #tpu.pipeline_mode<synchronous>, transform_indices = @transform_6, window_bounds = array<i64: 1, 128>}, {transform_indices = @transform_7, window_bounds = array<i64: 16, 128>}]} {
    %c0 = arith.constant 0 : index
    %c0_0 = arith.constant 0 : index
    %0 = vector.load %arg1[%c0, %c0_0] : memref<16x128xf32, #tpu.memory_space<vmem>>, vector<16x128xf32>
    %c0_1 = arith.constant 0 : index
    %c0_2 = arith.constant 0 : index
    %1 = vector.load %arg2[%c0_1, %c0_2] : memref<128x128xbf16, #tpu.memory_space<vmem>>, vector<128x128xbf16>
    %c0_3 = arith.constant 0 : index
    %c0_4 = arith.constant 0 : index
    %2 = vector.load %arg3[%c0_3, %c0_4] : memref<1x128xf32, #tpu.memory_space<vmem>>, vector<1x128xf32>
    %3 = arith.truncf %0 : vector<16x128xf32> to vector<16x128xbf16>
    %cst = arith.constant dense<0.000000e+00> : vector<16x128xf32>
    %4 = tpu.matmul %3, %1, %cst {dimension_numbers = #tpu.dot_dimension_numbers<[1], [0], [0], [1], [0, 0, 1, 1], [], []>} : vector<16x128xbf16>, vector<128x128xbf16>, vector<16x128xf32> -> vector<16x128xf32>
    %5 = vector.broadcast %2 : vector<1x128xf32> to vector<16x128xf32>
    %6 = arith.addf %4, %5 : vector<16x128xf32>
    %cst_5 = arith.constant 0.000000e+00 : f32
    %7 = vector.broadcast %cst_5 : f32 to vector<16x128xf32>
    %8 = arith.cmpf ogt, %6, %7 : vector<16x128xf32>
    %cst_6 = arith.constant 1.000000e-01 : f32
    %9 = vector.broadcast %cst_6 : f32 to vector<16x128xf32>
    %10 = arith.mulf %9, %6 : vector<16x128xf32>
    %11 = arith.select %8, %6, %10 : vector<16x128xi1>, vector<16x128xf32>
    %c0_7 = arith.constant 0 : index
    %c0_8 = arith.constant 0 : index
    %12 = vector.load %arg9[%c0_7, %c0_8] : memref<16x128xf32, #tpu.memory_space<vmem>>, vector<16x128xf32>
    tpu.vector_store %arg9[%c0_7, %c0_8], %11 {strides = array<i32>} : memref<16x128xf32, #tpu.memory_space<vmem>>, vector<16x128xf32>,
    %c0_9 = arith.constant 0 : index
    %c0_10 = arith.constant 0 : index
    %13 = vector.load %arg9[%c0_9, %c0_10] : memref<16x128xf32, #tpu.memory_space<vmem>>, vector<16x128xf32>
    %c0_11 = arith.constant 0 : index
    %c0_12 = arith.constant 0 : index
    %14 = vector.load %arg4[%c0_11, %c0_12] : memref<128x128xbf16, #tpu.memory_space<vmem>>, vector<128x128xbf16>
    %c0_13 = arith.constant 0 : index
    %c0_14 = arith.constant 0 : index
    %15 = vector.load %arg5[%c0_13, %c0_14] : memref<1x128xf32, #tpu.memory_space<vmem>>, vector<1x128xf32>
    %16 = arith.truncf %13 : vector<16x128xf32> to vector<16x128xbf16>
    %cst_15 = arith.constant dense<0.000000e+00> : vector<16x128xf32>
    %17 = tpu.matmul %16, %14, %cst_15 {dimension_numbers = #tpu.dot_dimension_numbers<[1], [0], [0], [1], [0, 0, 1, 1], [], []>} : vector<16x128xbf16>, vector<128x128xbf16>, vector<16x128xf32> -> vector<16x128xf32>
    %18 = vector.broadcast %15 : vector<1x128xf32> to vector<16x128xf32>
    %19 = arith.addf %17, %18 : vector<16x128xf32>
    %cst_16 = arith.constant 0.000000e+00 : f32
    %20 = vector.broadcast %cst_16 : f32 to vector<16x128xf32>
    %21 = arith.cmpf ogt, %19, %20 : vector<16x128xf32>
    %cst_17 = arith.constant 1.000000e-01 : f32
    %22 = vector.broadcast %cst_17 : f32 to vector<16x128xf32>
    %23 = arith.mulf %22, %19 : vector<16x128xf32>
    %24 = arith.select %21, %19, %23 : vector<16x128xi1>, vector<16x128xf32>
    %c0_18 = arith.constant 0 : index
    %c0_19 = arith.constant 0 : index
    %25 = vector.load %arg10[%c0_18, %c0_19] : memref<16x128xf32, #tpu.memory_space<vmem>>, vector<16x128xf32>
    tpu.vector_store %arg10[%c0_18, %c0_19], %24 {strides = array<i32>} : memref<16x128xf32, #tpu.memory_space<vmem>>, vector<16x128xf32>,
    %c0_20 = arith.constant 0 : index
    %c0_21 = arith.constant 0 : index
    %26 = vector.load %arg10[%c0_20, %c0_21] : memref<16x128xf32, #tpu.memory_space<vmem>>, vector<16x128xf32>
    %c0_22 = arith.constant 0 : index
    %c0_23 = arith.constant 0 : index
    %27 = vector.load %arg6[%c0_22, %c0_23] : memref<128x128xbf16, #tpu.memory_space<vmem>>, vector<128x128xbf16>
    %c0_24 = arith.constant 0 : index
    %c0_25 = arith.constant 0 : index
    %28 = vector.load %arg7[%c0_24, %c0_25] : memref<1x128xf32, #tpu.memory_space<vmem>>, vector<1x128xf32>
    %29 = arith.truncf %26 : vector<16x128xf32> to vector<16x128xbf16>
    %cst_26 = arith.constant dense<0.000000e+00> : vector<16x128xf32>
    %30 = tpu.matmul %29, %27, %cst_26 {dimension_numbers = #tpu.dot_dimension_numbers<[1], [0], [0], [1], [0, 0, 1, 1], [], []>} : vector<16x128xbf16>, vector<128x128xbf16>, vector<16x128xf32> -> vector<16x128xf32>
    %31 = vector.broadcast %28 : vector<1x128xf32> to vector<16x128xf32>
    %32 = arith.addf %30, %31 : vector<16x128xf32>
    %c0_27 = arith.constant 0 : index
    %c0_28 = arith.constant 0 : index
    %33 = vector.load %arg8[%c0_27, %c0_28] : memref<16x128xf32, #tpu.memory_space<vmem>>, vector<16x128xf32>
    tpu.vector_store %arg8[%c0_27, %c0_28], %32 {strides = array<i32>} : memref<16x128xf32, #tpu.memory_space<vmem>>, vector<16x128xf32>,
    return
  }
  func.func @transform_0(%arg0: i32) -> (i32, i32) {
    %c0_i32 = arith.constant 0 : i32
    %c0_i32_0 = arith.constant 0 : i32
    return %arg0, %c0_i32 : i32, i32
  }
  func.func @transform_1(%arg0: i32) -> (i32, i32) {
    %c0_i32 = arith.constant 0 : i32
    %c0_i32_0 = arith.constant 0 : i32
    %c0_i32_1 = arith.constant 0 : i32
    return %c0_i32, %c0_i32_0 : i32, i32
  }
  func.func @transform_2(%arg0: i32) -> (i32, i32) {
    %c0_i32 = arith.constant 0 : i32
    %c0_i32_0 = arith.constant 0 : i32
    %c0_i32_1 = arith.constant 0 : i32
    return %c0_i32, %c0_i32_0 : i32, i32
  }
  func.func @transform_3(%arg0: i32) -> (i32, i32) {
    %c0_i32 = arith.constant 0 : i32
    %c0_i32_0 = arith.constant 0 : i32
    %c0_i32_1 = arith.constant 0 : i32
    return %c0_i32, %c0_i32_0 : i32, i32
  }
  func.func @transform_4(%arg0: i32) -> (i32, i32) {
    %c0_i32 = arith.constant 0 : i32
    %c0_i32_0 = arith.constant 0 : i32
    %c0_i32_1 = arith.constant 0 : i32
    return %c0_i32, %c0_i32_0 : i32, i32
  }
  func.func @transform_5(%arg0: i32) -> (i32, i32) {
    %c0_i32 = arith.constant 0 : i32
    %c0_i32_0 = arith.constant 0 : i32
    %c0_i32_1 = arith.constant 0 : i32
    return %c0_i32, %c0_i32_0 : i32, i32
  }
  func.func @transform_6(%arg0: i32) -> (i32, i32) {
    %c0_i32 = arith.constant 0 : i32
    %c0_i32_0 = arith.constant 0 : i32
    %c0_i32_1 = arith.constant 0 : i32
    return %c0_i32, %c0_i32_0 : i32, i32
  }
  func.func @transform_7(%arg0: i32) -> (i32, i32) {
    %c0_i32 = arith.constant 0 : i32
    %c0_i32_0 = arith.constant 0 : i32
    return %arg0, %c0_i32 : i32, i32
  }
}

</mosaic_0001>

<bundles_post_ra>
// kernel: _lambda_.1
= control target key start
LH: loop header
LB: loop body
LE: loop exit
PB: predicated region body
PF: predicated region fallthrough
CT: control target
= control target key end

     0   :  { %12 = vsyncpa [#allocation5], 0  ;;  %s802_s0 = inlined_call_operand.vmem [shape: f32[16,128], index: 0, kind: input, shape index: {}]   ;;  %s803_s1 = inlined_call_operand.hbm [shape: bf16[128,128], index: 1, kind: input, shape index: {}]   ;;  %s804_s2 = inlined_call_operand.vmem [shape: f32[1,128], index: 2, kind: input, shape index: {}]   ;;  %s805_s3 = inlined_call_operand.hbm [shape: bf16[128,128], index: 3, kind: input, shape index: {}]   ;;  %s806_s4 = inlined_call_operand.vmem [shape: f32[1,128], index: 4, kind: input, shape index: {}]   ;;  %s807_s5 = inlined_call_operand.hbm [shape: bf16[128,128], index: 5, kind: input, shape index: {}]   ;;  %s808_s6 = inlined_call_operand.vmem [shape: f32[1,128], index: 6, kind: input, shape index: {}]   ;;  %s809_s7 = inlined_call_operand.vmem [shape: f32[16,128], index: 7, kind: output, shape index: {}]  }
   0x1   :  { %13 = vsyncpa [#allocation7], 0  ;;  %s652_s24 = smov [#allocation6]   ;;  %s653_s26 = smov [#allocation4]  }
   0x2   :  { %s35_s25 = sshll.u32 %s652_s24, 4  ;;  %s21_s27 = sshll.u32 %s653_s26, 4  ;;  %s36_s25 = int_to_ptr.vmem [resolvable:$true] %s35_s25  ;;  %s699_s27 = int_to_ptr.vmem [resolvable:$true] %s21_s27 }
   0x3   :  { %s582_s30 = scalar_lea.hbm %s805_s3, 1024 }
   0x4   :  { %p583_p0 = scmp.ne.s32.totalorder %s805_s3, %s582_s30  ;;  %p586_p1 = scmp.lt.u32.totalorder %s582_s30, %s805_s3 }
   0x6   :  { %p588_p2 = pnand %p586_p1, %p583_p0 }
   0x8   :  { %591 = shalt.err (!%p588_p2)
}
   0x9   :  { %s592_s12 = scalar_lea.vmem %s36_s25, 1024  ;;  %p597_p4 = scmp.lt.s32.totalorder %s36_s25, %s36_s25 }
   0xa   :  { %p593_p3 = scmp.ne.s32.totalorder %s36_s25, %s592_s12  ;;  %p598_p5 = scmp.lt.s32.totalorder %s592_s12, %s592_s12 }
   0xc   :  { %p599_p6 = por %p598_p5, %p597_p4 }
   0xe   :  { %p600_p7 = pnand %p599_p6, %p593_p3 }
  0x10   :  { %603 = shalt.err (!%p600_p7)
}
  0x11   :  { %s654_s13 = smov 64   ;;  %s655_s14 = smov 4  }
  0x12   :  { %41 = dma.hbm_to_vmem [thread:$0]  %s805_s3, 1024, %s36_s25, [#allocation7], %s654_s13, %s654_s13, %s655_s14  }
  0x13   :  { %s604_s19 = scalar_lea.hbm %s803_s1, 1024 }
  0x14   :  { %p605_p8 = scmp.ne.s32.totalorder %s803_s1, %s604_s19  ;;  %p608_p9 = scmp.lt.u32.totalorder %s604_s19, %s803_s1 }
  0x16   :  { %p610_p10 = pnand %p608_p9, %p605_p8 }
  0x18   :  { %613 = shalt.err (!%p610_p10)
}
  0x19   :  { %s614_s24 = scalar_lea.vmem %s699_s27, 1024  ;;  %p619_p12 = scmp.lt.s32.totalorder %s699_s27, %s699_s27 }
  0x1a   :  { %p615_p11 = scmp.ne.s32.totalorder %s699_s27, %s614_s24  ;;  %p620_p13 = scmp.lt.s32.totalorder %s614_s24, %s614_s24 }
  0x1c   :  { %p621_p0 = por %p620_p13, %p619_p12 }
  0x1e   :  { %p622_p1 = pnand %p621_p0, %p615_p11 }
  0x20   :  { %625 = shalt.err (!%p622_p1)
}
  0x21   :  { %27 = dma.hbm_to_vmem [thread:$0]  %s803_s1, 1024, %s699_s27, [#allocation5], %s654_s13, %s654_s13, %s655_s14  }
  0x22   :  { %s656_s26 = smov [#allocation8]   ;;  %s626_s8 = scalar_lea.hbm %s807_s5, 1024 }
  0x23   :  { %s49_s28 = sshll.u32 %s656_s26, 4  ;;  %p627_p2 = scmp.ne.s32.totalorder %s807_s5, %s626_s8  ;;  %s50_s28 = int_to_ptr.vmem [resolvable:$true] %s49_s28 }
  0x24   :  { %p630_p3 = scmp.lt.u32.totalorder %s626_s8, %s807_s5 }
  0x26   :  { %p632_p4 = pnand %p630_p3, %p627_p2 }
  0x28   :  { %635 = shalt.err (!%p632_p4)
}
  0x29   :  { %s636_s15 = scalar_lea.vmem %s50_s28, 1024  ;;  %p641_p6 = scmp.lt.s32.totalorder %s50_s28, %s50_s28 }
  0x2a   :  { %p637_p5 = scmp.ne.s32.totalorder %s50_s28, %s636_s15  ;;  %p642_p7 = scmp.lt.s32.totalorder %s636_s15, %s636_s15 }
  0x2c   :  { %p643_p8 = por %p642_p7, %p641_p6 }
  0x2e   :  { %p644_p9 = pnand %p643_p8, %p637_p5 }
  0x30   :  { %647 = shalt.err (!%p644_p9)
}
  0x31   :  { %55 = dma.hbm_to_vmem [thread:$0]  %s807_s5, 1024, %s50_s28, [#allocation7], %s654_s13, %s654_s13, %s655_s14  }
  0x32   :  { %648 = dma.done.wait [#allocation5], 1024  }
  0x33   :  { %649 = vsyncadd [#allocation5], 4294966272 }
  0x34   :  { %650 = dma.done.wait [#allocation7], 2048  }
  0x35   :  { %651 = vsyncadd [#allocation7], 4294965248  ;;  %v657_v0 = vmov 0.0   ;;  %vm658_vm0 = vmmov 0   ;;  %v558_v1 = vld [vmem:[#allocation4] sm:$0xff]   ;;  %v559_v2 = vld [vmem:[#allocation4 + $0x8] sm:$0xff]  }
  0x36   :  { %491 = vmatprep.subr.bf16.mxu0 %v657_v0  ;;  %507 = vmatprep.mubr.msk.bf16.mxu0 %vm658_vm0, %v657_v0  ;;  %v560_v3 = vld [vmem:[#allocation4 + $0x10] sm:$0xff]   ;;  %v566_v4 = vld [vmem:[#allocation6] sm:$0xff]   ;;  %v561_v5 = vld [vmem:[#allocation4 + $0x18] sm:$0xff]  }
  0x37   :  { %511 = vmatprep.subr.bf16.mxu1 %v657_v0  ;;  %527 = vmatprep.mubr.msk.bf16.mxu1 %vm658_vm0, %v657_v0  ;;  %v567_v6 = vld [vmem:[#allocation6 + $0x8] sm:$0xff]   ;;  %v562_v7 = vld [vmem:[#allocation4 + $0x20] sm:$0xff]   ;;  %v568_v8 = vld [vmem:[#allocation6 + $0x10] sm:$0xff]  }
  0x38   :  { %492 = vmatpush3.bf16.msra.mxu0 %v558_v1  ;;  %512 = vmatpush3.bf16.msra.mxu1 %v566_v4  ;;  %v563_v9 = vld [vmem:[#allocation4 + $0x28] sm:$0xff]   ;;  %v569_v10 = vld [vmem:[#allocation6 + $0x18] sm:$0xff]   ;;  %v564_v11 = vld [vmem:[#allocation4 + $0x30] sm:$0xff]  }
  0x39   :  { %493 = vmatprep.subr.bf16.mxu0 %v657_v0  ;;  %513 = vmatprep.subr.bf16.mxu1 %v657_v0  ;;  %v570_v12 = vld [vmem:[#allocation6 + $0x20] sm:$0xff]   ;;  %v565_v13 = vld [vmem:[#allocation4 + $0x38] sm:$0xff]   ;;  %v69_v15 = vld [vmem:[%s802_s0 + $0x8] sm:$0xff] }
  0x3a   :  { %v68_v14 = vld [vmem:[%s802_s0] sm:$0xff]  ;;  %v571_v16 = vld [vmem:[#allocation6 + $0x28] sm:$0xff]   ;;  %v572_v18 = vld [vmem:[#allocation6 + $0x30] sm:$0xff]  }
  0x3b   :  { %v87_v17 = vpack.c.bf16 %v69_v15, %v68_v14  ;;  %v573_v19 = vld [vmem:[#allocation6 + $0x38] sm:$0xff]   ;;  %v574_v20 = vld [vmem:[#allocation8] sm:$0xff]   ;;  %v575_v21 = vld [vmem:[#allocation8 + $0x8] sm:$0xff]  }
  0x3c   :  { %494 = vmatpush3.bf16.msra.mxu0 %v559_v2  ;;  %514 = vmatpush3.bf16.msra.mxu1 %v567_v6  ;;  %v576_v22 = vld [vmem:[#allocation8 + $0x10] sm:$0xff]   ;;  %v577_v23 = vld [vmem:[#allocation8 + $0x18] sm:$0xff]   ;;  %v578_v24 = vld [vmem:[#allocation8 + $0x20] sm:$0xff]  }
  0x3d   :  { %495 = vmatprep.subr.bf16.mxu0 %v657_v0  ;;  %515 = vmatprep.subr.bf16.mxu1 %v657_v0  ;;  %v579_v25 = vld [vmem:[#allocation8 + $0x28] sm:$0xff]   ;;  %v437_v26 = vld [vmem:[%s804_s2] ss:$0 sm:$0xff]  ;;  %v580_v38 = vld [vmem:[#allocation8 + $0x30] sm:$0xff]  }
  0x3e   :  { %v581_v39 = vld [vmem:[#allocation8 + $0x38] sm:$0xff]   ;;  %v446_v40 = vld [vmem:[%s806_s4] ss:$0 sm:$0xff] }
  0x3f   :  { %v455_v52 = vld [vmem:[%s808_s6] ss:$0 sm:$0xff] }
  0x40   :  { %496 = vmatpush3.bf16.msra.mxu0 %v560_v3  ;;  %516 = vmatpush3.bf16.msra.mxu1 %v568_v8 }
  0x41   :  { %497 = vmatprep.subr.bf16.mxu0 %v657_v0  ;;  %517 = vmatprep.subr.bf16.mxu1 %v657_v0 }
  0x44   :  { %498 = vmatpush3.bf16.msra.mxu0 %v561_v5  ;;  %518 = vmatpush3.bf16.msra.mxu1 %v569_v10 }
  0x45   :  { %499 = vmatprep.subr.bf16.mxu0 %v657_v0  ;;  %519 = vmatprep.subr.bf16.mxu1 %v657_v0 }
  0x48   :  { %500 = vmatpush3.bf16.msra.mxu0 %v562_v7  ;;  %520 = vmatpush3.bf16.msra.mxu1 %v570_v12 }
  0x49   :  { %501 = vmatprep.subr.bf16.mxu0 %v657_v0  ;;  %521 = vmatprep.subr.bf16.mxu1 %v657_v0 }
  0x4c   :  { %502 = vmatpush3.bf16.msra.mxu0 %v563_v9  ;;  %522 = vmatpush3.bf16.msra.mxu1 %v571_v16 }
  0x4d   :  { %503 = vmatprep.subr.bf16.mxu0 %v657_v0  ;;  %523 = vmatprep.subr.bf16.mxu1 %v657_v0 }
  0x50   :  { %504 = vmatpush3.bf16.msra.mxu0 %v564_v11  ;;  %524 = vmatpush3.bf16.msra.mxu1 %v572_v18 }
  0x51   :  { %505 = vmatprep.subr.bf16.mxu0 %v657_v0  ;;  %525 = vmatprep.subr.bf16.mxu1 %v657_v0 }
  0x54   :  { %506 = vmatpush3.bf16.msra.mxu0 %v565_v13  ;;  %526 = vmatpush3.bf16.msra.mxu1 %v573_v19 }
  0x55   :  { %531 = vmatprep.subr.bf16.mxu0 %v657_v0 }
  0x57   :  { %508 = vmatmul.mubr.bf16.vlgmr.msra.gmra.mrb[0].mxu0 %v87_v17 }
  0x58   :  { %547 = vmatprep.mubr.msk.bf16.mxu0 %vm658_vm0, %v657_v0  ;;  %532 = vmatpush3.bf16.msra.mxu0 %v574_v20 }
  0x59   :  { %533 = vmatprep.subr.bf16.mxu0 %v657_v0 }
  0x5c   :  { %534 = vmatpush3.bf16.msra.mxu0 %v575_v21 }
  0x5d   :  { %535 = vmatprep.subr.bf16.mxu0 %v657_v0 }
  0x60   :  { %536 = vmatpush3.bf16.msra.mxu0 %v576_v22 }
  0x61   :  { %537 = vmatprep.subr.bf16.mxu0 %v657_v0 }
  0x64   :  { %538 = vmatpush3.bf16.msra.mxu0 %v577_v23 }
  0x65   :  { %539 = vmatprep.subr.bf16.mxu0 %v657_v0 }
  0x68   :  { %540 = vmatpush3.bf16.msra.mxu0 %v578_v24 }
  0x69   :  { %541 = vmatprep.subr.bf16.mxu0 %v657_v0 }
  0x6c   :  { %542 = vmatpush3.bf16.msra.mxu0 %v579_v25 }
  0x6d   :  { %543 = vmatprep.subr.bf16.mxu0 %v657_v0 }
  0x70   :  { %544 = vmatpush3.bf16.msra.mxu0 %v580_v38 }
  0x71   :  { %545 = vmatprep.subr.bf16.mxu0 %v657_v0 }
  0x74   :  { %546 = vmatpush3.bf16.msra.mxu0 %v581_v39 }
 0x12a   :  { %v176_v27 = vpop.f32.mrb[0].mxu0 }
 0x12b   :  { %v177_v28 = vadd.f32 %v437_v26, %v176_v27  ;;  %v509_v29 = vpop.f32.mrb[1].mxu0 }
 0x12c   :  { %v179_v30 = vpop.f32.mrb[2].mxu0 }
 0x12d   :  { %v185_v31 = vmul.f32 0.1, %v177_v28  ;;  %v180_v32 = vadd.f32 %v437_v26, %v179_v30  ;;  %v510_v33 = vpop.f32.mrb[3].mxu0  ;;  %vm183_vm1 = vcmp.gt.f32.partialorder %v177_v28, 0.0 }
 0x12f   :  { %vm184_vm2 = vcmp.gt.f32.partialorder %v180_v32, 0.0  ;;  %v186_v34 = vmul.f32 0.1, %v180_v32  ;;  %v187_v35 = vsel %vm183_vm1, %v177_v28, %v185_v31 }
 0x131   :  { %v188_v36 = vsel %vm184_vm2, %v180_v32, %v186_v34 }
 0x132   :  { %v210_v37 = vpack.c.bf16 %v188_v36, %v187_v35 }
 0x134   :  { %528 = vmatmul.mubr.bf16.vlgmr.msra.gmra.mrb[0].mxu1 %v210_v37 }
 0x207   :  { %v299_v41 = vpop.f32.mrb[0].mxu1 }
 0x208   :  { %v300_v42 = vadd.f32 %v446_v40, %v299_v41  ;;  %v529_v43 = vpop.f32.mrb[1].mxu1 }
 0x209   :  { %v302_v44 = vpop.f32.mrb[2].mxu1 }
 0x20a   :  { %v308_v45 = vmul.f32 0.1, %v300_v42  ;;  %v303_v46 = vadd.f32 %v446_v40, %v302_v44  ;;  %v530_v47 = vpop.f32.mrb[3].mxu1  ;;  %vm306_vm3 = vcmp.gt.f32.partialorder %v300_v42, 0.0 }
 0x20c   :  { %vm307_vm4 = vcmp.gt.f32.partialorder %v303_v46, 0.0  ;;  %v309_v48 = vmul.f32 0.1, %v303_v46  ;;  %v310_v49 = vsel %vm306_vm3, %v300_v42, %v308_v45 }
 0x20e   :  { %v311_v50 = vsel %vm307_vm4, %v303_v46, %v309_v48 }
 0x20f   :  { %v333_v51 = vpack.c.bf16 %v311_v50, %v310_v49 }
 0x211   :  { %548 = vmatmul.mubr.bf16.vlgmr.msra.gmra.mrb[4].mxu0 %v333_v51 }
 0x2e4   :  { %v422_v53 = vpop.f32.mrb[4].mxu0 }
 0x2e5   :  { %v423_v54 = vadd.f32 %v455_v52, %v422_v53  ;;  %v549_v55 = vpop.f32.mrb[5].mxu0 }
 0x2e6   :  { %v425_v56 = vpop.f32.mrb[6].mxu0 }
 0x2e7   :  { %429 = vst [vmem:[%s809_s7] sm:$0xff] %v423_v54  ;;  %v426_v57 = vadd.f32 %v455_v52, %v425_v56  ;;  %v550_v58 = vpop.f32.mrb[7].mxu0 }
 0x2e9   :  { %430 = vst [vmem:[%s809_s7 + $0x8] sm:$0xff] %v426_v57 }
 0x2ea   :  { %435 = vsyncpa [#allocation5], 1 }
 0x2eb   :  { %436 = vsyncpa [#allocation7], 1 }

</bundles_post_ra>
